<compile_context>
chip_gen: v7x
topology: tpu7x:2x2x1
jax: 0.10.0
libtpu: 0.0.40
codegen_flags: <defaults>
</compile_context>

<pallas_src>
import math
from functools import partial

import numpy as np
import jax
import jax.numpy as jnp
from jax import lax
from jax.experimental import pallas as pl
from jax.experimental.pallas import tpu as pltpu

LN_EPS = 1e-5


# ----------------------------- shared helpers -------------------------------

def _ln(v, w, b):
    """LayerNorm over the last axis (v: (..., D), w/b broadcastable), f32 math."""
    mu = jnp.mean(v, axis=-1, keepdims=True)
    var = jnp.mean((v - mu) ** 2, axis=-1, keepdims=True)
    return (v - mu) * lax.rsqrt(var + LN_EPS) * w + b


# ------------------------------- kernels -------------------------------------

def transformer_kernel(x_in_ref, pos_ref,
                       ln1w_ref, ln1b_ref, wqkv_ref, bqkv_ref, wo_ref, bo_ref,
                       ln2w_ref, ln2b_ref, w1_ref, b1_ref, w2_ref, b2_ref,
                       o_ref, x_acc, *, n_head):
    """All transformer layers for one batch tile.

    grid = (num_batch_tiles, n_layers); the activation lives in the VMEM
    scratch `x_acc` across the layer axis and is written to HBM once at the
    last layer.  Weights are bf16; matmuls accumulate in f32.
    """
    layer = pl.program_id(1)
    n_layers = pl.num_programs(1)

    Bt, L, D = x_acc.shape
    H = n_head
    Dh = D // H
    scale = 1.0 / math.sqrt(Dh)

    # layer 0: load input tile and fuse the positional-embedding add.
    @pl.when(layer == 0)
    def _():
        x_acc[...] = x_in_ref[...].astype(jnp.float32) + pos_ref[...].astype(jnp.float32)

    x = x_acc[...].reshape(Bt * L, D)                       # (Bt*L, D) f32

    # ---------------- multi-head self-attention (causal) ----------------
    xn = _ln(x, ln1w_ref[0].astype(jnp.float32), ln1b_ref[0].astype(jnp.float32))
    qkv = jnp.dot(xn.astype(jnp.bfloat16), wqkv_ref[0],
                  preferred_element_type=jnp.float32) + bqkv_ref[0].astype(jnp.float32)
    q = qkv[:, 0 * D:1 * D].reshape(Bt, L, D)
    k = qkv[:, 1 * D:2 * D].reshape(Bt, L, D)
    v = qkv[:, 2 * D:3 * D].reshape(Bt, L, D)

    rows = lax.broadcasted_iota(jnp.int32, (L, L), 0)
    cols = lax.broadcasted_iota(jnp.int32, (L, L), 1)
    causal = jnp.where(cols <= rows, 0.0, -1e30).astype(jnp.float32)

    ctx = []
    for h in range(H):                                      # static, small H
        sl = slice(h * Dh, (h + 1) * Dh)
        qh = q[:, :, sl].astype(jnp.bfloat16)
        kh = k[:, :, sl].astype(jnp.bfloat16)
        vh = v[:, :, sl].astype(jnp.bfloat16)
        s = jnp.einsum('bqd,bkd->bqk', qh, kh,
                       preferred_element_type=jnp.float32) * scale + causal
        s = s - jnp.max(s, axis=-1, keepdims=True)
        p = jnp.exp(s)
        p = p * pl.reciprocal(jnp.sum(p, axis=-1, keepdims=True), approx=True)
        ctx.append(jnp.einsum('bqk,bkd->bqd', p.astype(jnp.bfloat16), vh,
                              preferred_element_type=jnp.float32))
    attn = jnp.concatenate(ctx, axis=-1).reshape(Bt * L, D)
    attn = jnp.dot(attn.astype(jnp.bfloat16), wo_ref[0],
                   preferred_element_type=jnp.float32) + bo_ref[0].astype(jnp.float32)
    x = x + attn

    # ---------------- MLP with QuickGELU (CLIP) ----------------
    xn2 = _ln(x, ln2w_ref[0].astype(jnp.float32), ln2b_ref[0].astype(jnp.float32))
    h1 = jnp.dot(xn2.astype(jnp.bfloat16), w1_ref[0],
                 preferred_element_type=jnp.float32) + b1_ref[0].astype(jnp.float32)
    h1 = h1 * jax.nn.sigmoid(1.702 * h1)
    h2 = jnp.dot(h1.astype(jnp.bfloat16), w2_ref[0],
                 preferred_element_type=jnp.float32) + b2_ref[0].astype(jnp.float32)
    x = x + h2

    x_acc[...] = x.reshape(Bt, L, D)

    @pl.when(layer == n_layers - 1)
    def _():
        o_ref[...] = x_acc[...].astype(o_ref.dtype)


def final_kernel(eot_ref, x_ref, lnw_ref, lnb_ref, proj_ref, o_ref, rows_scr):
    """ln_final + EOT gather (dynamic row read) + batched text_projection.

    grid = (B,). Each step reads only its EOT row (dynamic pl.ds on the
    sublane axis), LayerNorms it and stashes it into a (B, D) scratch.  At the
    last step a single M=B matmul projects all rows (output resident).
    LayerNorm is per-position, so it commutes with the gather.
    """
    b = pl.program_id(0)
    idx = eot_ref[b]
    row = x_ref[pl.ds(idx, 1), :].astype(jnp.float32)       # (1, D)
    rn = _ln(row, lnw_ref[...].astype(jnp.float32), lnb_ref[...].astype(jnp.float32))
    rows_scr[pl.ds(b, 1), :] = rn

    @pl.when(b == pl.num_programs(0) - 1)
    def _():
        o_ref[...] = jnp.dot(rows_scr[...].astype(jnp.bfloat16), proj_ref[...],
                             preferred_element_type=jnp.float32).astype(o_ref.dtype)


# ------------------------------- wrappers ------------------------------------

_W_NAMES = ("ln1w", "ln1b", "wqkv", "bqkv", "wo", "bo",
            "ln2w", "ln2b", "w1", "b1", "w2", "b2")


def run_transformer(x, params, block_b):
    B, L, D = x.shape
    n_layers = params["wqkv"].shape[0]
    ws = [params[n] for n in _W_NAMES]

    def wspec(p):
        # stacked (n_layers, r, c): select layer l, full (r, c) tile.
        return pl.BlockSpec((1,) + p.shape[1:], lambda b, l: (l, 0, 0))

    in_specs = ([pl.BlockSpec((block_b, L, D), lambda b, l: (b, 0, 0)),
                 pl.BlockSpec((L, D), lambda b, l: (0, 0))] +
                [wspec(p) for p in ws])

    return pl.pallas_call(
        partial(transformer_kernel, n_head=params["n_head"]),
        out_shape=jax.ShapeDtypeStruct((B, L, D), jnp.float32),
        grid_spec=pltpu.PrefetchScalarGridSpec(
            num_scalar_prefetch=0,
            grid=(B // block_b, n_layers),
            in_specs=in_specs,
            out_specs=pl.BlockSpec((block_b, L, D), lambda b, l: (b, 0, 0)),
            scratch_shapes=[pltpu.VMEM((block_b, L, D), jnp.float32)]),
        compiler_params=pltpu.CompilerParams(
            dimension_semantics=("parallel", "arbitrary"),
            vmem_limit_bytes=32 * 1024 * 1024),
    )(x, params["pos_emb"], *ws)


def run_final(x, eot_idx, lnf_w, lnf_b, text_proj):
    B, L, D = x.shape
    E = text_proj.shape[-1]
    # TODO(synk): could DMA only the EOT row via a data-dependent index_map
    #   (block (1, 1, D) with eot[b]) instead of the full (L, D) tile.
    return pl.pallas_call(
        final_kernel,
        out_shape=jax.ShapeDtypeStruct((B, E), jnp.float32),
        grid_spec=pltpu.PrefetchScalarGridSpec(
            num_scalar_prefetch=1, grid=(B,),
            in_specs=[pl.BlockSpec((None, L, D), lambda b, eot: (b, 0, 0)),
                      pl.BlockSpec((1, D), lambda b, eot: (0, 0)),
                      pl.BlockSpec((1, D), lambda b, eot: (0, 0)),
                      pl.BlockSpec((D, E), lambda b, eot: (0, 0))],
            out_specs=pl.BlockSpec((B, E), lambda b, eot: (0, 0)),
            scratch_shapes=[pltpu.VMEM((B, D), jnp.float32)]),
        compiler_params=pltpu.CompilerParams(
            dimension_semantics=("arbitrary",),
            vmem_limit_bytes=32 * 1024 * 1024),
    )(eot_idx, x, lnf_w, lnf_b, text_proj)


def _pick_block_b(B, L, target_rows=256):
    """Largest divisor of B such that block_b * L stays near the MXU sweet spot."""
    target = max(1, target_rows // max(L, 1))
    best = 1
    for d in range(1, B + 1):
        if B % d == 0 and d <= target:
            best = d
    return best


def text_encoder_forward(prompts, tokenized_prompts, params, block_b=None):
    """Equivalent of TextEncoder.forward(prompts, tokenized_prompts,
    if_embedding=True, if_sequence=False).  The permute(1,0,2) round-trip in
    the PyTorch code is a layout convention only; kernels stay (B, L, D)."""
    B, L, _ = prompts.shape
    if block_b is None:
        block_b = _pick_block_b(B, L)
    x = run_transformer(prompts, params, block_b)
    eot = jnp.argmax(tokenized_prompts, axis=-1).astype(jnp.int32)
    return run_final(x, eot, params["lnf_w"], params["lnf_b"], params["text_proj"])


# --------------------------- parameter creation -----------------------------

def init_params(key, L, D, E, n_head, n_layers):
    hidden = 4 * D
    keys = iter(jax.random.split(key, 16))

    def nrm(shape, scale=0.02, dtype=jnp.float32):
        return (jax.random.normal(next(keys), shape, jnp.float32) * scale).astype(dtype)

    return {
        # stacked per-layer weights; big matrices in bf16, LN params/biases f32
        "ln1w": jnp.ones((n_layers, 1, D), jnp.float32),
        "ln1b": jnp.zeros((n_layers, 1, D), jnp.float32),
        "wqkv": nrm((n_layers, D, 3 * D), dtype=jnp.bfloat16),
        "bqkv": nrm((n_layers, 1, 3 * D)),
        "wo":   nrm((n_layers, D, D), dtype=jnp.bfloat16),
        "bo":   nrm((n_layers, 1, D)),
        "ln2w": jnp.ones((n_layers, 1, D), jnp.float32),
        "ln2b": jnp.zeros((n_layers, 1, D), jnp.float32),
        "w1":   nrm((n_layers, D, hidden), dtype=jnp.bfloat16),
        "b1":   nrm((n_layers, 1, hidden)),
        "w2":   nrm((n_layers, hidden, D), dtype=jnp.bfloat16),
        "b2":   nrm((n_layers, 1, D)),
        "pos_emb": nrm((L, D), 0.01),
        "lnf_w": jnp.ones((1, D), jnp.float32),
        "lnf_b": jnp.zeros((1, D), jnp.float32),
        "text_proj": nrm((D, E), dtype=jnp.bfloat16),
        "n_head": n_head,
    }


# ----------------------------- pure-JAX reference ---------------------------

def ref_forward(prompts, tokenized_prompts, params):
    H = params["n_head"]
    n_layers = params["wqkv"].shape[0]
    B, L, D = prompts.shape
    Dh = D // H

    x = prompts + params["pos_emb"]
    causal = jnp.where(jnp.arange(L)[None, :] <= jnp.arange(L)[:, None], 0.0, -1e30)

    for l in range(n_layers):
        xn = _ln(x, params["ln1w"][l], params["ln1b"][l])
        qkv = xn @ params["wqkv"][l].astype(jnp.float32) + params["bqkv"][l]
        q, k, v = jnp.split(qkv, 3, axis=-1)
        q = q.reshape(B, L, H, Dh)
        k = k.reshape(B, L, H, Dh)
        v = v.reshape(B, L, H, Dh)
        s = jnp.einsum('bqhd,bkhd->bhqk', q, k) / math.sqrt(Dh) + causal
        p = jax.nn.softmax(s, axis=-1)
        ctx = jnp.einsum('bhqk,bkhd->bqhd', p, v).reshape(B, L, D)
        x = x + ctx @ params["wo"][l].astype(jnp.float32) + params["bo"][l]

        xn2 = _ln(x, params["ln2w"][l], params["ln2b"][l])
        h1 = xn2 @ params["w1"][l].astype(jnp.float32) + params["b1"][l]
        h1 = h1 * jax.nn.sigmoid(1.702 * h1)
        x = x + h1 @ params["w2"][l].astype(jnp.float32) + params["b2"][l]

    xn = _ln(x, params["lnf_w"], params["lnf_b"])
    eot = jnp.argmax(tokenized_prompts, axis=-1)
    pooled = xn[jnp.arange(B), eot]
    return pooled @ params["text_proj"].astype(jnp.float32)


# --------------------------------- main --------------------------------------

if __name__ == "__main__":
    B, L, D, H, E, n_layers = 2, 8, 32, 2, 64, 2

    key = jax.random.PRNGKey(0)
    k_prompts, k_tok, k_params = jax.random.split(key, 3)

    prompts = jax.random.normal(k_prompts, (B, L, D), jnp.float32) * 0.1
    tokenized_prompts = jax.random.randint(k_tok, (B, L), 1, 1000).astype(jnp.int32)
    params = init_params(k_params, L, D, E, H, n_layers)

    out = text_encoder_forward(prompts, tokenized_prompts, params)
    out = jax.block_until_ready(out)

    ref = ref_forward(prompts, tokenized_prompts, params)
    assert out.shape == (B, E)
    # kernel uses bf16 matmul operands with f32 accumulation; reference is f32
    np.testing.assert_allclose(np.asarray(out), np.asarray(ref), atol=1e-2, rtol=1e-2)

    print("KERNEL_OK")
</pallas_src>

<mosaic_0001>
module attributes {stable_mosaic.version = 11 : i64} {
  func.func @transformer_kernel(%arg0: i32, %arg1: i32, %arg2: memref<2x8x32xf32, #tpu.memory_space<vmem>>, %arg3: memref<8x32xf32, #tpu.memory_space<vmem>>, %arg4: memref<1x1x32xf32, #tpu.memory_space<vmem>>, %arg5: memref<1x1x32xf32, #tpu.memory_space<vmem>>, %arg6: memref<1x32x96xbf16, #tpu.memory_space<vmem>>, %arg7: memref<1x1x96xf32, #tpu.memory_space<vmem>>, %arg8: memref<1x32x32xbf16, #tpu.memory_space<vmem>>, %arg9: memref<1x1x32xf32, #tpu.memory_space<vmem>>, %arg10: memref<1x1x32xf32, #tpu.memory_space<vmem>>, %arg11: memref<1x1x32xf32, #tpu.memory_space<vmem>>, %arg12: memref<1x32x128xbf16, #tpu.memory_space<vmem>>, %arg13: memref<1x1x128xf32, #tpu.memory_space<vmem>>, %arg14: memref<1x128x32xbf16, #tpu.memory_space<vmem>>, %arg15: memref<1x1x32xf32, #tpu.memory_space<vmem>>, %arg16: memref<2x8x32xf32, #tpu.memory_space<vmem>>, %arg17: memref<2x8x32xf32, #tpu.memory_space<vmem>>) attributes {dimension_semantics = [#tpu.dimension_semantics<parallel>, #tpu.dimension_semantics<arbitrary>], iteration_bounds = array<i64: 1, 2>, scalar_prefetch = 0 : i64, scratch_operands = 1 : i64, tpu.core_type = #tpu.core_type<tc>, window_params = [{transform_indices = @transform_0, window_bounds = array<i64: 2, 8, 32>}, {pipeline_mode = #tpu.pipeline_mode<synchronous>, transform_indices = @transform_1, window_bounds = array<i64: 8, 32>}, {transform_indices = @transform_2, window_bounds = array<i64: 1, 1, 32>}, {transform_indices = @transform_3, window_bounds = array<i64: 1, 1, 32>}, {transform_indices = @transform_4, window_bounds = array<i64: 1, 32, 96>}, {transform_indices = @transform_5, window_bounds = array<i64: 1, 1, 96>}, {transform_indices = @transform_6, window_bounds = array<i64: 1, 32, 32>}, {transform_indices = @transform_7, window_bounds = array<i64: 1, 1, 32>}, {transform_indices = @transform_8, window_bounds = array<i64: 1, 1, 32>}, {transform_indices = @transform_9, window_bounds = array<i64: 1, 1, 32>}, {transform_indices = @transform_10, window_bounds = array<i64: 1, 32, 128>}, {transform_indices = @transform_11, window_bounds = array<i64: 1, 1, 128>}, {transform_indices = @transform_12, window_bounds = array<i64: 1, 128, 32>}, {transform_indices = @transform_13, window_bounds = array<i64: 1, 1, 32>}, {transform_indices = @transform_14, window_bounds = array<i64: 2, 8, 32>}]} {
    %c0_i32 = arith.constant 0 : i32
    %0 = arith.cmpi eq, %arg1, %c0_i32 : i32
    %1 = arith.extui %0 : i1 to i32
    %c0_i32_0 = arith.constant 0 : i32
    %2 = arith.cmpi ne, %1, %c0_i32_0 : i32
    scf.if %2 {
      %c0_70 = arith.constant 0 : index
      %c0_71 = arith.constant 0 : index
      %c0_72 = arith.constant 0 : index
      %166 = vector.load %arg2[%c0_70, %c0_71, %c0_72] : memref<2x8x32xf32, #tpu.memory_space<vmem>>, vector<2x8x32xf32>
      %c0_73 = arith.constant 0 : index
      %c0_74 = arith.constant 0 : index
      %167 = vector.load %arg3[%c0_73, %c0_74] : memref<8x32xf32, #tpu.memory_space<vmem>>, vector<8x32xf32>
      %168 = vector.shape_cast %167 : vector<8x32xf32> to vector<1x8x32xf32>
      %169 = vector.broadcast %168 : vector<1x8x32xf32> to vector<2x8x32xf32>
      %170 = arith.addf %166, %169 : vector<2x8x32xf32>
      %c0_75 = arith.constant 0 : index
      %c0_76 = arith.constant 0 : index
      %c0_77 = arith.constant 0 : index
      %171 = vector.load %arg17[%c0_75, %c0_76, %c0_77] : memref<2x8x32xf32, #tpu.memory_space<vmem>>, vector<2x8x32xf32>
      tpu.vector_store %arg17[%c0_75, %c0_76, %c0_77], %170 {strides = array<i32>} : memref<2x8x32xf32, #tpu.memory_space<vmem>>, vector<2x8x32xf32>,
    } else {
    }
    %c0 = arith.constant 0 : index
    %c0_1 = arith.constant 0 : index
    %c0_2 = arith.constant 0 : index
    %3 = vector.load %arg17[%c0, %c0_1, %c0_2] : memref<2x8x32xf32, #tpu.memory_space<vmem>>, vector<2x8x32xf32>
    %4 = vector.shape_cast %3 : vector<2x8x32xf32> to vector<16x32xf32>
    %c0_3 = arith.constant 0 : index
    %c0_4 = arith.constant 0 : index
    %c0_5 = arith.constant 0 : index
    %5 = vector.load %arg4[%c0_3, %c0_4, %c0_5] : memref<1x1x32xf32, #tpu.memory_space<vmem>>, vector<1x1x32xf32>
    %6 = vector.shape_cast %5 : vector<1x1x32xf32> to vector<1x32xf32>
    %c0_6 = arith.constant 0 : index
    %c0_7 = arith.constant 0 : index
    %c0_8 = arith.constant 0 : index
    %7 = vector.load %arg5[%c0_6, %c0_7, %c0_8] : memref<1x1x32xf32, #tpu.memory_space<vmem>>, vector<1x1x32xf32>
    %8 = vector.shape_cast %7 : vector<1x1x32xf32> to vector<1x32xf32>
    %cst = arith.constant dense<0.000000e+00> : vector<16xf32>
    %9 = vector.multi_reduction <add>, %4, %cst [1] : vector<16x32xf32> to vector<16xf32>
    %10 = vector.shape_cast %9 : vector<16xf32> to vector<16x1xf32>
    %cst_9 = arith.constant 3.200000e+01 : f32
    %11 = vector.broadcast %cst_9 : f32 to vector<16x1xf32>
    %12 = arith.divf %10, %11 : vector<16x1xf32>
    %13 = vector.broadcast %12 : vector<16x1xf32> to vector<16x32xf32>
    %14 = arith.subf %4, %13 : vector<16x32xf32>
    %15 = arith.mulf %14, %14 : vector<16x32xf32>
    %cst_10 = arith.constant dense<0.000000e+00> : vector<16xf32>
    %16 = vector.multi_reduction <add>, %15, %cst_10 [1] : vector<16x32xf32> to vector<16xf32>
    %17 = vector.shape_cast %16 : vector<16xf32> to vector<16x1xf32>
    %cst_11 = arith.constant 3.200000e+01 : f32
    %18 = vector.broadcast %cst_11 : f32 to vector<16x1xf32>
    %19 = arith.divf %17, %18 : vector<16x1xf32>
    %20 = vector.broadcast %12 : vector<16x1xf32> to vector<16x32xf32>
    %21 = arith.subf %4, %20 : vector<16x32xf32>
    %cst_12 = arith.constant 9.99999974E-6 : f32
    %22 = vector.broadcast %cst_12 : f32 to vector<16x1xf32>
    %23 = arith.addf %19, %22 : vector<16x1xf32>
    %24 = math.rsqrt %23 : vector<16x1xf32>
    %25 = vector.broadcast %24 : vector<16x1xf32> to vector<16x32xf32>
    %26 = arith.mulf %21, %25 : vector<16x32xf32>
    %27 = vector.broadcast %6 : vector<1x32xf32> to vector<16x32xf32>
    %28 = arith.mulf %26, %27 : vector<16x32xf32>
    %29 = vector.broadcast %8 : vector<1x32xf32> to vector<16x32xf32>
    %30 = arith.addf %28, %29 : vector<16x32xf32>
    %31 = arith.truncf %30 : vector<16x32xf32> to vector<16x32xbf16>
    %c0_13 = arith.constant 0 : index
    %c0_14 = arith.constant 0 : index
    %c0_15 = arith.constant 0 : index
    %32 = vector.load %arg6[%c0_13, %c0_14, %c0_15] : memref<1x32x96xbf16, #tpu.memory_space<vmem>>, vector<1x32x96xbf16>
    %33 = vector.shape_cast %32 : vector<1x32x96xbf16> to vector<32x96xbf16>
    %cst_16 = arith.constant dense<0.000000e+00> : vector<16x96xf32>
    %34 = tpu.matmul %31, %33, %cst_16 {dimension_numbers = #tpu.dot_dimension_numbers<[1], [0], [0], [1], [0, 0, 1, 1], [], []>} : vector<16x32xbf16>, vector<32x96xbf16>, vector<16x96xf32> -> vector<16x96xf32>
    %c0_17 = arith.constant 0 : index
    %c0_18 = arith.constant 0 : index
    %c0_19 = arith.constant 0 : index
    %35 = vector.load %arg7[%c0_17, %c0_18, %c0_19] : memref<1x1x96xf32, #tpu.memory_space<vmem>>, vector<1x1x96xf32>
    %36 = vector.shape_cast %35 : vector<1x1x96xf32> to vector<1x96xf32>
    %37 = vector.broadcast %36 : vector<1x96xf32> to vector<16x96xf32>
    %38 = arith.addf %34, %37 : vector<16x96xf32>
    %39 = vector.extract_strided_slice %38 {offsets = [0, 0], sizes = [16, 32], strides = [1, 1]} : vector<16x96xf32> to vector<16x32xf32>
    %40 = vector.shape_cast %39 : vector<16x32xf32> to vector<2x8x32xf32>
    %41 = vector.extract_strided_slice %38 {offsets = [0, 32], sizes = [16, 32], strides = [1, 1]} : vector<16x96xf32> to vector<16x32xf32>
    %42 = vector.shape_cast %41 : vector<16x32xf32> to vector<2x8x32xf32>
    %43 = vector.extract_strided_slice %38 {offsets = [0, 64], sizes = [16, 32], strides = [1, 1]} : vector<16x96xf32> to vector<16x32xf32>
    %44 = vector.shape_cast %43 : vector<16x32xf32> to vector<2x8x32xf32>
    %45 = tpu.iota {dimensions = array<i32: 0>} : vector<8x8xi32>
    %46 = tpu.iota {dimensions = array<i32: 1>} : vector<8x8xi32>
    %47 = arith.cmpi sle, %46, %45 : vector<8x8xi32>
    %cst_20 = arith.constant 0.000000e+00 : f32
    %cst_21 = arith.constant -1.000000e+30 : f32
    %48 = vector.broadcast %cst_20 : f32 to vector<8x8xf32>
    %49 = vector.broadcast %cst_21 : f32 to vector<8x8xf32>
    %50 = arith.select %47, %48, %49 : vector<8x8xi1>, vector<8x8xf32>
    %51 = vector.extract_strided_slice %40 {offsets = [0, 0, 0], sizes = [2, 8, 16], strides = [1, 1, 1]} : vector<2x8x32xf32> to vector<2x8x16xf32>
    %52 = arith.truncf %51 : vector<2x8x16xf32> to vector<2x8x16xbf16>
    %53 = vector.extract_strided_slice %42 {offsets = [0, 0, 0], sizes = [2, 8, 16], strides = [1, 1, 1]} : vector<2x8x32xf32> to vector<2x8x16xf32>
    %54 = arith.truncf %53 : vector<2x8x16xf32> to vector<2x8x16xbf16>
    %55 = vector.extract_strided_slice %44 {offsets = [0, 0, 0], sizes = [2, 8, 16], strides = [1, 1, 1]} : vector<2x8x32xf32> to vector<2x8x16xf32>
    %56 = arith.truncf %55 : vector<2x8x16xf32> to vector<2x8x16xbf16>
    "tpu.trace_start"() <{level = 10 : i32, message = "bqd,bkd->bqk"}> : () -> ()
    %cst_22 = arith.constant dense<0.000000e+00> : vector<2x8x8xf32>
    %57 = tpu.matmul %52, %54, %cst_22 {dimension_numbers = #tpu.dot_dimension_numbers<[2], [2], [1], [1], [0, 0, 0, 1, 1, 1], [0], [0]>} : vector<2x8x16xbf16>, vector<2x8x16xbf16>, vector<2x8x8xf32> -> vector<2x8x8xf32>
    "tpu.trace_stop"() : () -> ()
    %cst_23 = arith.constant 2.500000e-01 : f32
    %58 = vector.broadcast %cst_23 : f32 to vector<2x8x8xf32>
    %59 = arith.mulf %57, %58 : vector<2x8x8xf32>
    %60 = vector.shape_cast %50 : vector<8x8xf32> to vector<1x8x8xf32>
    %61 = vector.broadcast %60 : vector<1x8x8xf32> to vector<2x8x8xf32>
    %62 = arith.addf %59, %61 : vector<2x8x8xf32>
    %cst_24 = arith.constant dense<0xFF800000> : vector<2x8xf32>
    %63 = vector.multi_reduction <maximumf>, %62, %cst_24 [2] : vector<2x8x8xf32> to vector<2x8xf32>
    %64 = vector.shape_cast %63 : vector<2x8xf32> to vector<2x8x1xf32>
    %65 = vector.broadcast %64 : vector<2x8x1xf32> to vector<2x8x8xf32>
    %66 = arith.subf %62, %65 : vector<2x8x8xf32>
    %67 = math.exp %66 : vector<2x8x8xf32>
    %cst_25 = arith.constant dense<0.000000e+00> : vector<2x8xf32>
    %68 = vector.multi_reduction <add>, %67, %cst_25 [2] : vector<2x8x8xf32> to vector<2x8xf32>
    %69 = vector.shape_cast %68 : vector<2x8xf32> to vector<2x8x1xf32>
    %70 = tpu.reciprocal %69 {approx = true} : vector<2x8x1xf32> -> vector<2x8x1xf32>
    %71 = vector.broadcast %70 : vector<2x8x1xf32> to vector<2x8x8xf32>
    %72 = arith.mulf %67, %71 : vector<2x8x8xf32>
    %73 = arith.truncf %72 : vector<2x8x8xf32> to vector<2x8x8xbf16>
    "tpu.trace_start"() <{level = 10 : i32, message = "bqk,bkd->bqd"}> : () -> ()
    %cst_26 = arith.constant dense<0.000000e+00> : vector<2x8x16xf32>
    %74 = tpu.matmul %73, %56, %cst_26 {dimension_numbers = #tpu.dot_dimension_numbers<[2], [1], [1], [2], [0, 0, 0, 1, 1, 2], [0], [0]>} : vector<2x8x8xbf16>, vector<2x8x16xbf16>, vector<2x8x16xf32> -> vector<2x8x16xf32>
    "tpu.trace_stop"() : () -> ()
    %75 = vector.extract_strided_slice %40 {offsets = [0, 0, 16], sizes = [2, 8, 16], strides = [1, 1, 1]} : vector<2x8x32xf32> to vector<2x8x16xf32>
    %76 = arith.truncf %75 : vector<2x8x16xf32> to vector<2x8x16xbf16>
    %77 = vector.extract_strided_slice %42 {offsets = [0, 0, 16], sizes = [2, 8, 16], strides = [1, 1, 1]} : vector<2x8x32xf32> to vector<2x8x16xf32>
    %78 = arith.truncf %77 : vector<2x8x16xf32> to vector<2x8x16xbf16>
    %79 = vector.extract_strided_slice %44 {offsets = [0, 0, 16], sizes = [2, 8, 16], strides = [1, 1, 1]} : vector<2x8x32xf32> to vector<2x8x16xf32>
    %80 = arith.truncf %79 : vector<2x8x16xf32> to vector<2x8x16xbf16>
    "tpu.trace_start"() <{level = 10 : i32, message = "bqd,bkd->bqk"}> : () -> ()
    %cst_27 = arith.constant dense<0.000000e+00> : vector<2x8x8xf32>
    %81 = tpu.matmul %76, %78, %cst_27 {dimension_numbers = #tpu.dot_dimension_numbers<[2], [2], [1], [1], [0, 0, 0, 1, 1, 1], [0], [0]>} : vector<2x8x16xbf16>, vector<2x8x16xbf16>, vector<2x8x8xf32> -> vector<2x8x8xf32>
    "tpu.trace_stop"() : () -> ()
    %cst_28 = arith.constant 2.500000e-01 : f32
    %82 = vector.broadcast %cst_28 : f32 to vector<2x8x8xf32>
    %83 = arith.mulf %81, %82 : vector<2x8x8xf32>
    %84 = vector.shape_cast %50 : vector<8x8xf32> to vector<1x8x8xf32>
    %85 = vector.broadcast %84 : vector<1x8x8xf32> to vector<2x8x8xf32>
    %86 = arith.addf %83, %85 : vector<2x8x8xf32>
    %cst_29 = arith.constant dense<0xFF800000> : vector<2x8xf32>
    %87 = vector.multi_reduction <maximumf>, %86, %cst_29 [2] : vector<2x8x8xf32> to vector<2x8xf32>
    %88 = vector.shape_cast %87 : vector<2x8xf32> to vector<2x8x1xf32>
    %89 = vector.broadcast %88 : vector<2x8x1xf32> to vector<2x8x8xf32>
    %90 = arith.subf %86, %89 : vector<2x8x8xf32>
    %91 = math.exp %90 : vector<2x8x8xf32>
    %cst_30 = arith.constant dense<0.000000e+00> : vector<2x8xf32>
    %92 = vector.multi_reduction <add>, %91, %cst_30 [2] : vector<2x8x8xf32> to vector<2x8xf32>
    %93 = vector.shape_cast %92 : vector<2x8xf32> to vector<2x8x1xf32>
    %94 = tpu.reciprocal %93 {approx = true} : vector<2x8x1xf32> -> vector<2x8x1xf32>
    %95 = vector.broadcast %94 : vector<2x8x1xf32> to vector<2x8x8xf32>
    %96 = arith.mulf %91, %95 : vector<2x8x8xf32>
    %97 = arith.truncf %96 : vector<2x8x8xf32> to vector<2x8x8xbf16>
    "tpu.trace_start"() <{level = 10 : i32, message = "bqk,bkd->bqd"}> : () -> ()
    %cst_31 = arith.constant dense<0.000000e+00> : vector<2x8x16xf32>
    %98 = tpu.matmul %97, %80, %cst_31 {dimension_numbers = #tpu.dot_dimension_numbers<[2], [1], [1], [2], [0, 0, 0, 1, 1, 2], [0], [0]>} : vector<2x8x8xbf16>, vector<2x8x16xbf16>, vector<2x8x16xf32> -> vector<2x8x16xf32>
    "tpu.trace_stop"() : () -> ()
    %99 = tpu.concatenate %74, %98 in 2 : vector<2x8x16xf32>, vector<2x8x16xf32> -> vector<2x8x32xf32>
    %100 = vector.shape_cast %99 : vector<2x8x32xf32> to vector<16x32xf32>
    %101 = arith.truncf %100 : vector<16x32xf32> to vector<16x32xbf16>
    %c0_32 = arith.constant 0 : index
    %c0_33 = arith.constant 0 : index
    %c0_34 = arith.constant 0 : index
    %102 = vector.load %arg8[%c0_32, %c0_33, %c0_34] : memref<1x32x32xbf16, #tpu.memory_space<vmem>>, vector<1x32x32xbf16>
    %103 = vector.shape_cast %102 : vector<1x32x32xbf16> to vector<32x32xbf16>
    %cst_35 = arith.constant dense<0.000000e+00> : vector<16x32xf32>
    %104 = tpu.matmul %101, %103, %cst_35 {dimension_numbers = #tpu.dot_dimension_numbers<[1], [0], [0], [1], [0, 0, 1, 1], [], []>} : vector<16x32xbf16>, vector<32x32xbf16>, vector<16x32xf32> -> vector<16x32xf32>
    %c0_36 = arith.constant 0 : index
    %c0_37 = arith.constant 0 : index
    %c0_38 = arith.constant 0 : index
    %105 = vector.load %arg9[%c0_36, %c0_37, %c0_38] : memref<1x1x32xf32, #tpu.memory_space<vmem>>, vector<1x1x32xf32>
    %106 = vector.shape_cast %105 : vector<1x1x32xf32> to vector<1x32xf32>
    %107 = vector.broadcast %106 : vector<1x32xf32> to vector<16x32xf32>
    %108 = arith.addf %104, %107 : vector<16x32xf32>
    %109 = arith.addf %4, %108 : vector<16x32xf32>
    %c0_39 = arith.constant 0 : index
    %c0_40 = arith.constant 0 : index
    %c0_41 = arith.constant 0 : index
    %110 = vector.load %arg10[%c0_39, %c0_40, %c0_41] : memref<1x1x32xf32, #tpu.memory_space<vmem>>, vector<1x1x32xf32>
    %111 = vector.shape_cast %110 : vector<1x1x32xf32> to vector<1x32xf32>
    %c0_42 = arith.constant 0 : index
    %c0_43 = arith.constant 0 : index
    %c0_44 = arith.constant 0 : index
    %112 = vector.load %arg11[%c0_42, %c0_43, %c0_44] : memref<1x1x32xf32, #tpu.memory_space<vmem>>, vector<1x1x32xf32>
    %113 = vector.shape_cast %112 : vector<1x1x32xf32> to vector<1x32xf32>
    %cst_45 = arith.constant dense<0.000000e+00> : vector<16xf32>
    %114 = vector.multi_reduction <add>, %109, %cst_45 [1] : vector<16x32xf32> to vector<16xf32>
    %115 = vector.shape_cast %114 : vector<16xf32> to vector<16x1xf32>
    %cst_46 = arith.constant 3.200000e+01 : f32
    %116 = vector.broadcast %cst_46 : f32 to vector<16x1xf32>
    %117 = arith.divf %115, %116 : vector<16x1xf32>
    %118 = vector.broadcast %117 : vector<16x1xf32> to vector<16x32xf32>
    %119 = arith.subf %109, %118 : vector<16x32xf32>
    %120 = arith.mulf %119, %119 : vector<16x32xf32>
    %cst_47 = arith.constant dense<0.000000e+00> : vector<16xf32>
    %121 = vector.multi_reduction <add>, %120, %cst_47 [1] : vector<16x32xf32> to vector<16xf32>
    %122 = vector.shape_cast %121 : vector<16xf32> to vector<16x1xf32>
    %cst_48 = arith.constant 3.200000e+01 : f32
    %123 = vector.broadcast %cst_48 : f32 to vector<16x1xf32>
    %124 = arith.divf %122, %123 : vector<16x1xf32>
    %125 = vector.broadcast %117 : vector<16x1xf32> to vector<16x32xf32>
    %126 = arith.subf %109, %125 : vector<16x32xf32>
    %cst_49 = arith.constant 9.99999974E-6 : f32
    %127 = vector.broadcast %cst_49 : f32 to vector<16x1xf32>
    %128 = arith.addf %124, %127 : vector<16x1xf32>
    %129 = math.rsqrt %128 : vector<16x1xf32>
    %130 = vector.broadcast %129 : vector<16x1xf32> to vector<16x32xf32>
    %131 = arith.mulf %126, %130 : vector<16x32xf32>
    %132 = vector.broadcast %111 : vector<1x32xf32> to vector<16x32xf32>
    %133 = arith.mulf %131, %132 : vector<16x32xf32>
    %134 = vector.broadcast %113 : vector<1x32xf32> to vector<16x32xf32>
    %135 = arith.addf %133, %134 : vector<16x32xf32>
    %136 = arith.truncf %135 : vector<16x32xf32> to vector<16x32xbf16>
    %c0_50 = arith.constant 0 : index
    %c0_51 = arith.constant 0 : index
    %c0_52 = arith.constant 0 : index
    %137 = vector.load %arg12[%c0_50, %c0_51, %c0_52] : memref<1x32x128xbf16, #tpu.memory_space<vmem>>, vector<1x32x128xbf16>
    %138 = vector.shape_cast %137 : vector<1x32x128xbf16> to vector<32x128xbf16>
    %cst_53 = arith.constant dense<0.000000e+00> : vector<16x128xf32>
    %139 = tpu.matmul %136, %138, %cst_53 {dimension_numbers = #tpu.dot_dimension_numbers<[1], [0], [0], [1], [0, 0, 1, 1], [], []>} : vector<16x32xbf16>, vector<32x128xbf16>, vector<16x128xf32> -> vector<16x128xf32>
    %c0_54 = arith.constant 0 : index
    %c0_55 = arith.constant 0 : index
    %c0_56 = arith.constant 0 : index
    %140 = vector.load %arg13[%c0_54, %c0_55, %c0_56] : memref<1x1x128xf32, #tpu.memory_space<vmem>>, vector<1x1x128xf32>
    %141 = vector.shape_cast %140 : vector<1x1x128xf32> to vector<1x128xf32>
    %142 = vector.broadcast %141 : vector<1x128xf32> to vector<16x128xf32>
    %143 = arith.addf %139, %142 : vector<16x128xf32>
    %cst_57 = arith.constant 1.702000e+00 : f32
    %144 = vector.broadcast %cst_57 : f32 to vector<16x128xf32>
    %145 = arith.mulf %144, %143 : vector<16x128xf32>
    %146 = arith.negf %145 : vector<16x128xf32>
    %147 = math.exp %146 : vector<16x128xf32>
    %cst_58 = arith.constant 1.000000e+00 : f32
    %148 = vector.broadcast %cst_58 : f32 to vector<16x128xf32>
    %149 = arith.addf %148, %147 : vector<16x128xf32>
    %150 = arith.divf %148, %149 : vector<16x128xf32>
    %151 = arith.mulf %143, %150 : vector<16x128xf32>
    %152 = arith.truncf %151 : vector<16x128xf32> to vector<16x128xbf16>
    %c0_59 = arith.constant 0 : index
    %c0_60 = arith.constant 0 : index
    %c0_61 = arith.constant 0 : index
    %153 = vector.load %arg14[%c0_59, %c0_60, %c0_61] : memref<1x128x32xbf16, #tpu.memory_space<vmem>>, vector<1x128x32xbf16>
    %154 = vector.shape_cast %153 : vector<1x128x32xbf16> to vector<128x32xbf16>
    %cst_62 = arith.constant dense<0.000000e+00> : vector<16x32xf32>
    %155 = tpu.matmul %152, %154, %cst_62 {dimension_numbers = #tpu.dot_dimension_numbers<[1], [0], [0], [1], [0, 0, 1, 1], [], []>} : vector<16x128xbf16>, vector<128x32xbf16>, vector<16x32xf32> -> vector<16x32xf32>
    %c0_63 = arith.constant 0 : index
    %c0_64 = arith.constant 0 : index
    %c0_65 = arith.constant 0 : index
    %156 = vector.load %arg15[%c0_63, %c0_64, %c0_65] : memref<1x1x32xf32, #tpu.memory_space<vmem>>, vector<1x1x32xf32>
    %157 = vector.shape_cast %156 : vector<1x1x32xf32> to vector<1x32xf32>
    %158 = vector.broadcast %157 : vector<1x32xf32> to vector<16x32xf32>
    %159 = arith.addf %155, %158 : vector<16x32xf32>
    %160 = arith.addf %109, %159 : vector<16x32xf32>
    %161 = vector.shape_cast %160 : vector<16x32xf32> to vector<2x8x32xf32>
    %c0_66 = arith.constant 0 : index
    %c0_67 = arith.constant 0 : index
    %c0_68 = arith.constant 0 : index
    %162 = vector.load %arg17[%c0_66, %c0_67, %c0_68] : memref<2x8x32xf32, #tpu.memory_space<vmem>>, vector<2x8x32xf32>
    tpu.vector_store %arg17[%c0_66, %c0_67, %c0_68], %161 {strides = array<i32>} : memref<2x8x32xf32, #tpu.memory_space<vmem>>, vector<2x8x32xf32>,
    %c1_i32 = arith.constant 1 : i32
    %163 = arith.cmpi eq, %arg1, %c1_i32 : i32
    %164 = arith.extui %163 : i1 to i32
    %c0_i32_69 = arith.constant 0 : i32
    %165 = arith.cmpi ne, %164, %c0_i32_69 : i32
    scf.if %165 {
      %c0_70 = arith.constant 0 : index
      %c0_71 = arith.constant 0 : index
      %c0_72 = arith.constant 0 : index
      %166 = vector.load %arg17[%c0_70, %c0_71, %c0_72] : memref<2x8x32xf32, #tpu.memory_space<vmem>>, vector<2x8x32xf32>
      %c0_73 = arith.constant 0 : index
      %c0_74 = arith.constant 0 : index
      %c0_75 = arith.constant 0 : index
      %167 = vector.load %arg16[%c0_73, %c0_74, %c0_75] : memref<2x8x32xf32, #tpu.memory_space<vmem>>, vector<2x8x32xf32>
      tpu.vector_store %arg16[%c0_73, %c0_74, %c0_75], %166 {strides = array<i32>} : memref<2x8x32xf32, #tpu.memory_space<vmem>>, vector<2x8x32xf32>,
    } else {
    }
    return
  }
  func.func @transform_0(%arg0: i32, %arg1: i32) -> (i32, i32, i32) {
    %c0_i32 = arith.constant 0 : i32
    %c0_i32_0 = arith.constant 0 : i32
    %c0_i32_1 = arith.constant 0 : i32
    return %arg0, %c0_i32, %c0_i32_0 : i32, i32, i32
  }
  func.func @transform_1(%arg0: i32, %arg1: i32) -> (i32, i32) {
    %c0_i32 = arith.constant 0 : i32
    %c0_i32_0 = arith.constant 0 : i32
    %c0_i32_1 = arith.constant 0 : i32
    return %c0_i32, %c0_i32_0 : i32, i32
  }
  func.func @transform_2(%arg0: i32, %arg1: i32) -> (i32, i32, i32) {
    %c0_i32 = arith.constant 0 : i32
    %c0_i32_0 = arith.constant 0 : i32
    %c0_i32_1 = arith.constant 0 : i32
    return %arg1, %c0_i32, %c0_i32_0 : i32, i32, i32
  }
  func.func @transform_3(%arg0: i32, %arg1: i32) -> (i32, i32, i32) {
    %c0_i32 = arith.constant 0 : i32
    %c0_i32_0 = arith.constant 0 : i32
    %c0_i32_1 = arith.constant 0 : i32
    return %arg1, %c0_i32, %c0_i32_0 : i32, i32, i32
  }
  func.func @transform_4(%arg0: i32, %arg1: i32) -> (i32, i32, i32) {
    %c0_i32 = arith.constant 0 : i32
    %c0_i32_0 = arith.constant 0 : i32
    %c0_i32_1 = arith.constant 0 : i32
    return %arg1, %c0_i32, %c0_i32_0 : i32, i32, i32
  }
  func.func @transform_5(%arg0: i32, %arg1: i32) -> (i32, i32, i32) {
    %c0_i32 = arith.constant 0 : i32
    %c0_i32_0 = arith.constant 0 : i32
    %c0_i32_1 = arith.constant 0 : i32
    return %arg1, %c0_i32, %c0_i32_0 : i32, i32, i32
  }
  func.func @transform_6(%arg0: i32, %arg1: i32) -> (i32, i32, i32) {
    %c0_i32 = arith.constant 0 : i32
    %c0_i32_0 = arith.constant 0 : i32
    %c0_i32_1 = arith.constant 0 : i32
    return %arg1, %c0_i32, %c0_i32_0 : i32, i32, i32
  }
  func.func @transform_7(%arg0: i32, %arg1: i32) -> (i32, i32, i32) {
    %c0_i32 = arith.constant 0 : i32
    %c0_i32_0 = arith.constant 0 : i32
    %c0_i32_1 = arith.constant 0 : i32
    return %arg1, %c0_i32, %c0_i32_0 : i32, i32, i32
  }
  func.func @transform_8(%arg0: i32, %arg1: i32) -> (i32, i32, i32) {
    %c0_i32 = arith.constant 0 : i32
    %c0_i32_0 = arith.constant 0 : i32
    %c0_i32_1 = arith.constant 0 : i32
    return %arg1, %c0_i32, %c0_i32_0 : i32, i32, i32
  }
  func.func @transform_9(%arg0: i32, %arg1: i32) -> (i32, i32, i32) {
    %c0_i32 = arith.constant 0 : i32
    %c0_i32_0 = arith.constant 0 : i32
    %c0_i32_1 = arith.constant 0 : i32
    return %arg1, %c0_i32, %c0_i32_0 : i32, i32, i32
  }
  func.func @transform_10(%arg0: i32, %arg1: i32) -> (i32, i32, i32) {
    %c0_i32 = arith.constant 0 : i32
    %c0_i32_0 = arith.constant 0 : i32
    %c0_i32_1 = arith.constant 0 : i32
    return %arg1, %c0_i32, %c0_i32_0 : i32, i32, i32
  }
  func.func @transform_11(%arg0: i32, %arg1: i32) -> (i32, i32, i32) {
    %c0_i32 = arith.constant 0 : i32
    %c0_i32_0 = arith.constant 0 : i32
    %c0_i32_1 = arith.constant 0 : i32
    return %arg1, %c0_i32, %c0_i32_0 : i32, i32, i32
  }
  func.func @transform_12(%arg0: i32, %arg1: i32) -> (i32, i32, i32) {
    %c0_i32 = arith.constant 0 : i32
    %c0_i32_0 = arith.constant 0 : i32
    %c0_i32_1 = arith.constant 0 : i32
    return %arg1, %c0_i32, %c0_i32_0 : i32, i32, i32
  }
  func.func @transform_13(%arg0: i32, %arg1: i32) -> (i32, i32, i32) {
    %c0_i32 = arith.constant 0 : i32
    %c0_i32_0 = arith.constant 0 : i32
    %c0_i32_1 = arith.constant 0 : i32
    return %arg1, %c0_i32, %c0_i32_0 : i32, i32, i32
  }
  func.func @transform_14(%arg0: i32, %arg1: i32) -> (i32, i32, i32) {
    %c0_i32 = arith.constant 0 : i32
    %c0_i32_0 = arith.constant 0 : i32
    %c0_i32_1 = arith.constant 0 : i32
    return %arg0, %c0_i32, %c0_i32_0 : i32, i32, i32
  }
}

</mosaic_0001>

<bundles_post_ra>
// kernel: tpu_custom_call.1
= control target key start
LH: loop header
LB: loop body
LE: loop exit
PB: predicated region body
PF: predicated region fallthrough
CT: control target
= control target key end

     0   :  { %s2504_s0 = inlined_call_operand.vmem [shape: f32[2,8,32], index: 0, kind: input, shape index: {}]   ;;  %s2505_s1 = inlined_call_operand.vmem [shape: f32[8,32], index: 1, kind: input, shape index: {}]   ;;  %s2506_s2 = inlined_call_operand.vmem [shape: f32[2,1,32], index: 2, kind: input, shape index: {}]   ;;  %s2507_s3 = inlined_call_operand.vmem [shape: f32[2,1,32], index: 3, kind: input, shape index: {}]   ;;  %s2508_s4 = inlined_call_operand.vmem [shape: bf16[2,32,96], index: 4, kind: input, shape index: {}]   ;;  %s2509_s5 = inlined_call_operand.vmem [shape: f32[2,1,96], index: 5, kind: input, shape index: {}]   ;;  %s2510_s6 = inlined_call_operand.vmem [shape: bf16[2,32,32], index: 6, kind: input, shape index: {}]   ;;  %s2511_s7 = inlined_call_operand.vmem [shape: f32[2,1,32], index: 7, kind: input, shape index: {}]   ;;  %s2512_s8 = inlined_call_operand.vmem [shape: f32[2,1,32], index: 8, kind: input, shape index: {}]   ;;  %s2513_s9 = inlined_call_operand.vmem [shape: f32[2,1,32], index: 9, kind: input, shape index: {}]   ;;  %s2514_s10 = inlined_call_operand.vmem [shape: bf16[2,32,128], index: 10, kind: input, shape index: {}]   ;;  %s2515_s11 = inlined_call_operand.vmem [shape: f32[2,1,128], index: 11, kind: input, shape index: {}]   ;;  %s2516_s12 = inlined_call_operand.vmem [shape: bf16[2,128,32], index: 12, kind: input, shape index: {}]   ;;  %s2517_s13 = inlined_call_operand.vmem [shape: f32[2,1,32], index: 13, kind: input, shape index: {}]   ;;  %s2518_s14 = inlined_call_operand.hbm [shape: f32[2,8,32], index: 14, kind: output, shape index: {}]  }
   0x1   :  { %2523 = sst [smem:[#allocation10_spill]] %s2507_s3 }
   0x2   :  { %2524 = sst [smem:[#allocation11_spill]] %s2508_s4 }
   0x3   :  { %2525 = sst [smem:[#allocation12_spill]] %s2510_s6 }
   0x4   :  { %2526 = sst [smem:[#allocation13_spill]] %s2518_s14 }
   0x5   :  { %19 = vsyncpa [#allocation4], 0  ;;  %s2188_s29 = smov 0   ;;  %s2190_s30 = smov 0  }
   0x6   :  { %s2192_s15 = smov 0  }
   0x7 LB: > { %2527 = sst [smem:[#allocation6_spill]] %s2095_s30  ;;  %s34_s17 = sadd.s32 1, %s2095_s30  ;;  %s2099_s15 = sphi %s2192_s15, %s25_s15   ;;  %s2095_s30 = sphi %s2190_s30, %s2546_s30   ;;  %s2091_s29 = sphi %s2188_s29, %s2545_s29  }
   0x8   : > { %2528 = sst [smem:[#allocation7_spill]] %s2099_s15  ;;  %p35_p0 = scmp.ge.s32.totalorder %s34_s17, 2 }
   0x9   : > { %p1774_p1 = scmp.ge.s32.totalorder %s2099_s15, 1  ;;  %p530_p2 = scmp.lt.s32.totalorder %s2099_s15, 3 }
   0xa   : > { %s2548_s17 = smov (%p35_p0, %s34_s17), 0 }
   0xb   : > { %2529 = sst [smem:[#allocation8_spill]] %s2548_s17  ;;  %p531_p3 = pnand %p1774_p1, %p530_p2 }
   0xd   : > { %534 = sbr.rel (%p531_p3) target bundleno = 3153 (0xc51), region = 76 }
  0x14   : > { %p621_p4 = scmp.lt.s32.totalorder %s2091_s29, 1  ;;  %s2531_s4 = sld [smem:[#allocation11_spill]] }
  0x15   : > { %s2532_s6 = sld [smem:[#allocation12_spill]]  ;;  %p1783_p5 = scmp.ne.s32.totalorder %s2091_s29, 0 }
  0x16   : > { %s2211_s18 = scalar_select %p621_p4, %s2091_s29, 1 }
  0x17   : > { %670 = sbr.rel (%p1783_p5) target bundleno = 30 (0x1e), region = 80  ;;  %v671_v0 = vld [vmem:[%s2504_s0] sm:$0xff] (!%p1783_p5)  ;;  %vm676_vm0 = vcmask (!%p1783_p5), 261120   ;;  %v672_v2 = vld [vmem:[%s2504_s0 + $0x8] sm:$0xff] (!%p1783_p5) }
  0x18   : > { %s1824_s25 = sshll.u32 %s2211_s18, 4  ;;  %s645_s3 = scalar_lea.vmem %s2512_s8, %s2211_s18  ;;  %v673_v1 = vld [vmem:[%s2505_s1] sm:$0xff] (!%p1783_p5) }
  0x19   : > { %s648_s28 = scalar_lea.vmem %s2513_s9, %s2211_s18  ;;  %s664_s26 = scalar_lea.vmem %s2517_s13, %s2211_s18  ;;  %v674_v3 = vadd.f32 (!%p1783_p5), %v673_v1, %v671_v0  ;;  %v675_v4 = vadd.f32 (!%p1783_p5), %v673_v1, %v672_v2 }
  0x1a   : > { %s2229_s16 = scalar_lea.vmem %s2531_s4, %s1824_s25  ;;  %s2251_s4 = scalar_lea.vmem %s2514_s10, %s1824_s25 }
  0x1b   : > { %s2234_s14 = scalar_lea.vmem %s2532_s6, %s1824_s25  ;;  %s656_s6 = scalar_lea.vmem %s2515_s11, %s2211_s18  ;;  %677 = vst.msk [vmem:[#allocation2] sm:$0xff] (!%p1783_p5), %vm676_vm0, %v674_v3  ;;  %678 = vst.msk [vmem:[#allocation2 + $0x8] sm:$0xff] (!%p1783_p5), %vm676_vm0, %v675_v4 }
  0x1c   : > { %2533 = sst [smem:[#allocation9_spill]] %s2234_s14  ;;  %s1827_s14 = sshll.u32 %s2211_s18, 6 }
  0x1d   : > { %s2261_s22 = scalar_lea.vmem %s2516_s12, %s1827_s14 }
  0x1e PF: > { %vm683_vm1 = vcmask 261120   ;;  %v2001_v19 = vld [vmem:[%s2229_s16] sm:$0xff]   ;;  %v2101_v20 = vmov 0.0   ;;  %v2002_v21 = vld [vmem:[%s2229_s16 + $0x8] sm:$0xff]   ;;  %vm2102_vm2 = vmmov 0   ;;  %s2534_s15 = scalar_lea.vmem %s2506_s2, %s2211_s18  ;;  %s2535_s23 = sld [smem:[#allocation10_spill]]  ;;  %v795_v52 = vlaneseq }
  0x1f   : > { %1862 = vmatprep.subr.bf16.mxu0 %v2101_v20  ;;  %1882 = vmatprep.subr.bf16.mxu1 %v2101_v20  ;;  %v1784_v30 = vld [vmem:[%s2534_s15] ss:$0 sm:$0xff]  ;;  %s2537_s20 = scalar_lea.vmem %s2509_s5, %s2211_s18  ;;  %s2103_s30 = smov 96   ;;  %vm806_vm3 = vcmask 130048   ;;  %v2104_v56 = vmov -1e+30  }
  0x20   : > { %1863 = vmatpush3.bf16.msra.mxu0 %v2001_v19  ;;  %1866 = vmatprep.mubr.msk.bf16.mxu0 %vm2102_vm2, %v2101_v20  ;;  %v1786_v39 = vld [vmem:[%s2537_s20] ss:$0 sm:$0xff]  ;;  %v796_v53 = vshrl.u32 %v795_v52, 7  ;;  %v798_v54 = vand.u32 127, %v795_v52  ;;  %vm906_vm5 = vcmask 64512   ;;  %s2105_s17 = smov 64   ;;  %s2539_s25 = scalar_lea.vmem %s2511_s7, %s2211_s18 }
  0x21   : > { %1864 = vmatprep.subr.bf16.mxu0 %v2101_v20  ;;  %1884 = vmatprep.mubr.msk.bf16.mxu1 %vm2102_vm2, %v2101_v20  ;;  %s2106_s14 = smov 80   ;;  %vm936_vm6 = vcmask 1043456   ;;  %s2107_s16 = smov 112  }
  0x22   : > { %v2277_v5 = vld [vmem:[#allocation2] sm:$0xff]  ;;  %v2279_v6 = vld [vmem:[#allocation2 + $0x8] sm:$0xff]  ;;  %vm799_vm4 = vcmp.le.s32.totalorder %v798_v54, %v796_v53  ;;  %s2108_s15 = smov 48   ;;  %s2538_s21 = sld [smem:[#allocation9_spill]] }
  0x23   : > { %v684_v7 = vsel %vm683_vm1, %v2277_v5, 0.0  ;;  %v687_v8 = vsel %vm683_vm1, %v2279_v6, 0.0  ;;  %v2335_v57 = vsel %vm799_vm4, 0.0, %v2104_v56  ;;  %s2109_s24 = smov 16   ;;  %p1819_p6 = scmp.ne.s32.totalorder %s2091_s29, 1 }
  0x24   : > { %685 = vadd.xlane.f32.xlu0 %v684_v7  ;;  %1865 = vmatpush3.bf16.msra.mxu0 %v2002_v21  ;;  %s2536_s27 = scalar_lea.vmem %s2535_s23, %s2211_s18 }
  0x25   : > { %1870 = vmatprep.subr.bf16.mxu0 %v2101_v20  ;;  %v1785_v34 = vld [vmem:[%s2536_s27] ss:$0 sm:$0xff] }
  0x28   : > { %688 = vadd.xlane.f32.xlu0 %v687_v8 }
  0xb1   : > { %v686_v9 = vpop.xlane.xlu0 %685 }
  0xb2   : > { %v691_v10 = vmul.f32 0.03125, %v686_v9 }
  0xb4   : > { %v693_v11 = vsub.f32 %v2277_v5, %v691_v10 }
  0xb5   : > { %v689_v12 = vpop.xlane.xlu0 %688 }
  0xb6   : > { %v692_v13 = vmul.f32 0.03125, %v689_v12  ;;  %v695_v14 = vmul.f32 %v693_v11, %v693_v11 }
  0xb8   : > { %v694_v15 = vsub.f32 %v2279_v6, %v692_v13  ;;  %v697_v16 = vsel %vm683_vm1, %v695_v14, 0.0 }
  0xb9   : > { %698 = vadd.xlane.f32.xlu1 %v697_v16 }
  0xba   : > { %v696_v17 = vmul.f32 %v694_v15, %v694_v15 }
  0xbc   : > { %v700_v18 = vsel %vm683_vm1, %v696_v17, 0.0 }
  0xbd   : > { %701 = vadd.xlane.f32.xlu1 %v700_v18 }
 0x146   : > { %v699_v22 = vpop.xlane.xlu1 %698 }
 0x147   : > { %v703_v23 = vmul.f32 0.03125, %v699_v22 }
 0x149   : > { %v705_v24 = vadd.f32 1e-05, %v703_v23 }
 0x14a   : > { %v702_v25 = vpop.xlane.xlu1 %701 }
 0x14b   : > { %2015 = vrsqrt.f32 %v705_v24  ;;  %v704_v26 = vmul.f32 0.03125, %v702_v25 }
 0x14d   : > { %v706_v27 = vadd.f32 1e-05, %v704_v26 }
 0x14f   : > { %2017 = vrsqrt.f32 %v706_v27 }
 0x155   : > { %v2016_v28 = vpop.eup %2015 }
 0x156   : > { %v709_v29 = vmul.f32 %v2016_v28, %v693_v11 }
 0x158   : > { %v717_v33 = vmul.f32 %v1784_v30, %v709_v29 }
 0x159   : > { %v2018_v31 = vpop.eup %2017 }
 0x15a   : > { %v710_v32 = vmul.f32 %v2018_v31, %v694_v15  ;;  %v725_v36 = vadd.f32 %v1785_v34, %v717_v33 }
 0x15c   : > { %v718_v35 = vmul.f32 %v1784_v30, %v710_v32 }
 0x15e   : > { %v726_v37 = vadd.f32 %v1785_v34, %v718_v35 }
 0x160   : > { %v727_v38 = vpack.c.bf16 %v726_v37, %v725_v36 }
 0x162   : > { %1867 = vmatmul.mubr.msk.bf16.vlgmr.msra.gmra.mrb[0].mxu0 %vm683_vm1, %v727_v38 }
 0x163   : > { %1872 = vmatprep.mubr.msk.bf16.mxu0 %vm2102_vm2, %v2101_v20 }
 0x235   : > { %v788_v40 = vpop.f32.mrb[0].mxu0 }
 0x236   : > { %v789_v41 = vadd.f32 %v1786_v39, %v788_v40  ;;  %v1868_v42 = vpop.f32.mrb[1].mxu0 }
 0x237   : > { %v791_v43 = vpop.f32.mrb[2].mxu0 }
 0x238   : > { %v2317_v44 = vpack.c.bf16 %v789_v41, %v789_v41  ;;  %v792_v45 = vadd.f32 %v1786_v39, %v791_v43  ;;  %v1869_v46 = vpop.f32.mrb[3].mxu0 }
 0x23a   : > { %v2319_v47 = vpack.c.bf16 %v792_v45, %v792_v45  ;;  %804 = vrot.lane.b32.xlu0 %v2317_v44, %s2103_s30 }
 0x23c   : > { %854 = vrot.lane.b32.xlu1 %v2319_v47, %s2103_s30 }
 0x2ac   : > { %v805_v48 = vpop.permute.xlu0 %804 }
 0x2ad   : > { %v811_v49 = vsel %vm806_vm3, %v805_v48, 0 }
 0x2ae   : > { %1871 = vmatpush3.bf16.xpose.msra.mxu0 %v811_v49  ;;  %v855_v50 = vpop.permute.xlu1 %854 }
 0x2af   : > { %1876 = vmatprep.subr.bf16.mxu0 %v2101_v20  ;;  %v860_v51 = vsel %vm806_vm3, %v855_v50, 0 }
 0x2b5   : > { %1873 = vmatmul.mubr.msk.bf16.vlgmr.msra.gmra.mrb[4].mxu0 %vm806_vm3, %v2317_v44 }
 0x2b6   : > { %1877 = vmatpush3.bf16.xpose.msra.mxu0 %v860_v51  ;;  %1878 = vmatprep.mubr.msk.bf16.mxu0 %vm2102_vm2, %v2101_v20 }
 0x2b7   : > { %1888 = vmatprep.subr.bf16.mxu0 %v2101_v20 }
 0x2bd   : > { %1879 = vmatmul.mubr.msk.bf16.vlgmr.msra.gmra.mrb[8].mxu0 %vm806_vm3, %v2319_v47 }
 0x2be   : > { %1890 = vmatprep.mubr.msk.bf16.mxu0 %vm2102_vm2, %v2101_v20 }
 0x388   : > { %v847_v55 = vpop.f32.mrb[4].mxu0 }
 0x389   : > { %v902_v58 = vmul.f32 0.25, %v847_v55  ;;  %v1874_v59 = vpop.f32.mrb[5].mxu0 }
 0x38a   : > { %v850_v60 = vpop.f32.mrb[6].mxu0 }
 0x38b   : > { %v1875_v61 = vpop.f32.mrb[7].mxu0  ;;  %v904_v62 = vadd.f32 %v902_v58, %v2335_v57 }
 0x38d   : > { %v907_v63 = vsel %vm906_vm5, %v904_v62, -inf }
 0x38e   : > { %908 = vmax.xlane.f32.xlu1 %v907_v63 }
 0x390   : > { %v896_v0 = vpop.f32.mrb[8].mxu0 }
 0x391   : > { %v903_v1 = vmul.f32 0.25, %v896_v0  ;;  %v1880_v2 = vpop.f32.mrb[9].mxu0 }
 0x392   : > { %v899_v3 = vpop.f32.mrb[10].mxu0 }
 0x393   : > { %v1881_v4 = vpop.f32.mrb[11].mxu0  ;;  %v905_v7 = vadd.f32 %v903_v1, %v2335_v57 }
 0x395   : > { %v910_v8 = vsel %vm906_vm5, %v905_v7, -inf }
 0x396   : > { %911 = vmax.xlane.f32.xlu0 %v910_v8 }
 0x39f   : > { %980 = vrot.lane.b32.xlu1 %v2319_v47, %s2105_s17 }
 0x3a3   : > { %1030 = vrot.lane.b32.xlu1 %v2317_v44, %s2106_s14 }
 0x41b   : > { %v909_v9 = vpop.xlane.xlu1 %908 }
 0x41c   : > { %v913_v10 = vsub.f32 %v904_v62, %v909_v9 }
 0x41e   : > { %v915_v11 = vmul.f32 1.442695, %v913_v10 }
 0x41f   : > { %v981_v12 = vpop.permute.xlu1 %980 }
 0x420   : > { %2019 = vpow2.f32 %v915_v11  ;;  %v986_v13 = vsel %vm936_vm6, %v981_v12, 0 }
 0x421   : > { %1889 = vmatpush3.bf16.msra.mxu0 %v986_v13 }
 0x422   : > { %1900 = vmatprep.subr.bf16.mxu0 %v2101_v20 }
 0x423   : > { %v912_v14 = vpop.xlane.xlu0 %911  ;;  %v1031_v23 = vpop.permute.xlu1 %1030 }
 0x424   : > { %v914_v15 = vsub.f32 %v905_v7, %v912_v14  ;;  %v1036_v30 = vsel %vm806_vm3, %v1031_v23, 0 }
 0x426   : > { %v917_v16 = vmul.f32 1.442695, %v914_v15 }
 0x428   : > { %2021 = vpow2.f32 %v917_v16 }
 0x42a   : > { %v2020_v17 = vpop.eup %2019 }
 0x42b   : > { %v919_v18 = vsel %vm906_vm5, %v2020_v17, 0.0 }
 0x42c   : > { %920 = vadd.xlane.f32.xlu0 %v919_v18 }
 0x432   : > { %v2022_v19 = vpop.eup %2021 }
 0x433   : > { %v922_v21 = vsel %vm906_vm5, %v2022_v19, 0.0 }
 0x434   : > { %923 = vadd.xlane.f32.xlu1 %v922_v21  ;;  %v2003_v21 = vld [vmem:[%s2538_s21] sm:$0xff]  }
 0x442   : > { %931 = vrot.lane.b32.xlu0 %v2317_v44, %s2105_s17 }
 0x445   : > { %1080 = vrot.lane.b32.xlu1 %v2319_v47, %s2106_s14 }
 0x446   : > { %1028 = vrot.lane.b32.xlu0 %v2317_v44, %s2107_s16 }
 0x449   : > { %1078 = vrot.lane.b32.xlu1 %v2319_v47, %s2107_s16 }
 0x4b9   : > { %v921_v22 = vpop.xlane.xlu0 %920 }
 0x4ba   : > { %2023 = vrcp.f32 %v921_v22  ;;  %v2004_v22 = vld [vmem:[%s2538_s21 + $0x8] sm:$0xff]  }
 0x4bd   : > { %v932_v24 = vpop.permute.xlu0 %931 }
 0x4be   : > { %v938_v25 = vsel %vm936_vm6, %v932_v24, 0 }
 0x4bf   : > { %1883 = vmatpush3.bf16.msra.mxu1 %v938_v25 }
 0x4c0   : > { %1894 = vmatprep.subr.bf16.mxu1 %v2101_v20 }
 0x4c1   : > { %v924_v26 = vpop.xlane.xlu1 %923  ;;  %v1029_v35 = vpop.permute.xlu0 %1028 }
 0x4c2   : > { %2025 = vrcp.f32 %v924_v26 }
 0x4c4   : > { %v2024_v27 = vpop.eup %2023 }
 0x4c5   : > { %v927_v28 = vmul.f32 %v2024_v27, %v2020_v17  ;;  %v1081_v33 = vpop.permute.xlu1 %1080 }
 0x4c6   : > { %v1086_v36 = vsel %vm806_vm3, %v1081_v33, 0 }
 0x4c7   : > { %v929_v29 = vpack.c.bf16 %v927_v28, %v927_v28 }
 0x4c9   : > { %1885 = vmatmul.mubr.msk.bf16.vlgmr.msra.gmra.mrb[0].mxu1 %vm906_vm5, %v929_v29  ;;  %v1079_v37 = vpop.permute.xlu1 %1078 }
 0x4ca   : > { %1895 = vmatpush3.bf16.xpose.msra.mxu1 %v1036_v30  ;;  %1896 = vmatprep.mubr.msk.bf16.mxu1 %vm2102_vm2, %v2101_v20 }
 0x4cb   : > { %1906 = vmatprep.subr.bf16.mxu1 %v2101_v20 }
 0x4cc   : > { %v2026_v31 = vpop.eup %2025 }
 0x4cd   : > { %v928_v32 = vmul.f32 %v2026_v31, %v2022_v19 }
 0x4cf   : > { %v930_v34 = vpack.c.bf16 %v928_v32, %v928_v32 }
 0x4d1   : > { %1891 = vmatmul.mubr.msk.bf16.vlgmr.msra.gmra.mrb[12].mxu0 %vm906_vm5, %v930_v34  ;;  %1897 = vmatmul.mubr.msk.bf16.vlgmr.msra.gmra.mrb[4].mxu1 %vm806_vm3, %v1029_v35 }
 0x4d2   : > { %1901 = vmatpush3.bf16.xpose.msra.mxu0 %v1086_v36  ;;  %1902 = vmatprep.mubr.msk.bf16.mxu0 %vm2102_vm2, %v2101_v20 }
 0x4d3   : > { %1912 = vmatprep.subr.bf16.mxu0 %v2101_v20  ;;  %1908 = vmatprep.mubr.msk.bf16.mxu1 %vm2102_vm2, %v2101_v20 }
 0x4d9   : > { %1903 = vmatmul.mubr.msk.bf16.vlgmr.msra.gmra.mrb[16].mxu0 %vm806_vm3, %v1079_v37 }
 0x4da   : > { %1914 = vmatprep.mubr.msk.bf16.mxu0 %vm2102_vm2, %v2101_v20 }
 0x59c   : > { %v2369_v38 = vpop.f32.mrb[0].mxu1 }
 0x59d   : > { %v1886_v39 = vpop.f32.mrb[1].mxu1 }
 0x59e   : > { %v977_v40 = vpop.f32.mrb[2].mxu1  ;;  %v1798_v39 = vld [vmem:[%s2539_s25] ss:$0 sm:$0xff] }
 0x59f   : > { %v1887_v41 = vpop.f32.mrb[3].mxu1 }
 0x5a4   : > { %v2371_v42 = vpop.f32.mrb[12].mxu0  ;;  %v1072_v43 = vpop.f32.mrb[4].mxu1 }
 0x5a5   : > { %v1128_v45 = vmul.f32 0.25, %v1072_v43  ;;  %v1892_v46 = vpop.f32.mrb[13].mxu0  ;;  %v1898_v48 = vpop.f32.mrb[5].mxu1 }
 0x5a6   : > { %v1025_v49 = vpop.f32.mrb[14].mxu0  ;;  %v1075_v50 = vpop.f32.mrb[6].mxu1 }
 0x5a7   : > { %v1893_v51 = vpop.f32.mrb[15].mxu0  ;;  %v1899_v52 = vpop.f32.mrb[7].mxu1  ;;  %v1130_v53 = vadd.f32 %v1128_v45, %v2335_v57 }
 0x5a9   : > { %v1132_v54 = vsel %vm906_vm5, %v1130_v53, -inf }
 0x5aa   : > { %1133 = vmax.xlane.f32.xlu0 %v1132_v54 }
 0x5ac   : > { %v1122_v55 = vpop.f32.mrb[16].mxu0 }
 0x5ad   : > { %v1129_v56 = vmul.f32 0.25, %v1122_v55  ;;  %v1904_v58 = vpop.f32.mrb[17].mxu0 }
 0x5ae   : > { %v1125_v59 = vpop.f32.mrb[18].mxu0 }
 0x5af   : > { %v1905_v60 = vpop.f32.mrb[19].mxu0  ;;  %v1131_v61 = vadd.f32 %v1129_v56, %v2335_v57 }
 0x5b0   : > { %v2005_v60 = vld [vmem:[%s2251_s4] sm:$0xff]  }
 0x5b1   : > { %v1135_v62 = vsel %vm906_vm5, %v1131_v61, -inf }
 0x5b2   : > { %1136 = vmax.xlane.f32.xlu1 %v1135_v62 }
 0x5c3   : > { %1204 = vrot.lane.b32.xlu1 %v2319_v47, %s2108_s15 }
 0x637   : > { %v1134_v63 = vpop.xlane.xlu0 %1133 }
 0x638   : > { %v1138_v0 = vsub.f32 %v1130_v53, %v1134_v63 }
 0x63a   : > { %v1140_v1 = vmul.f32 1.442695, %v1138_v0 }
 0x63c   : > { %2027 = vpow2.f32 %v1140_v1 }
 0x63f   : > { %v1137_v2 = vpop.xlane.xlu1 %1136 }
 0x640   : > { %v1139_v3 = vsub.f32 %v1131_v61, %v1137_v2  ;;  %v2006_v61 = vld [vmem:[%s2251_s4 + $0x8] sm:$0xff]  }
 0x642   : > { %v1142_v4 = vmul.f32 1.442695, %v1139_v3 }
 0x643   : > { %v1205_v7 = vpop.permute.xlu1 %1204 }
 0x644   : > { %2029 = vpow2.f32 %v1142_v4  ;;  %v1210_v8 = vsel %vm936_vm6, %v1205_v7, 0 }
 0x645   : > { %1913 = vmatpush3.bf16.msra.mxu0 %v1210_v8  ;;  %v1802_v8 = vld [vmem:[%s645_s3] ss:$0 sm:$0xff] }
 0x646   : > { %v2028_v9 = vpop.eup %2027  ;;  %1926 = vmatprep.subr.bf16.mxu0 %v2101_v20 }
 0x647   : > { %v1144_v57 = vsel %vm906_vm5, %v2028_v9, 0.0 }
 0x648   : > { %1145 = vadd.xlane.f32.xlu0 %v1144_v57 }
 0x64e   : > { %v2030_v10 = vpop.eup %2029 }
 0x64f   : > { %v1147_v47 = vsel %vm906_vm5, %v2030_v10, 0.0 }
 0x650   : > { %1148 = vadd.xlane.f32.xlu0 %v1147_v47  ;;  %v1803_v47 = vld [vmem:[%s648_s28] ss:$0 sm:$0xff] }
 0x666   : > { %1156 = vrot.lane.b32.xlu0 %v2317_v44, %s2108_s15 }
 0x6d5   : > { %v1146_v11 = vpop.xlane.xlu0 %1145 }
 0x6d6   : > { %2031 = vrcp.f32 %v1146_v11 }
 0x6dd   : > { %v1149_v12 = vpop.xlane.xlu0 %1148 }
 0x6de   : > { %2033 = vrcp.f32 %v1149_v12 }
 0x6e0   : > { %v2032_v13 = vpop.eup %2031 }
 0x6e1   : > { %v1152_v14 = vmul.f32 %v2032_v13, %v2028_v9  ;;  %v1157_v15 = vpop.permute.xlu0 %1156 }
 0x6e2   : > { %v1162_v16 = vsel %vm936_vm6, %v1157_v15, 0  ;;  %v2007_v15 = vld [vmem:[%s2261_s22] sm:$0xff]  }
 0x6e3   : > { %1907 = vmatpush3.bf16.msra.mxu1 %v1162_v16  ;;  %v1154_v17 = vpack.c.bf16 %v1152_v14, %v1152_v14  ;;  %v2008_v16 = vld [vmem:[%s2261_s22 + $0x8] sm:$0xff]  }
 0x6e4   : > { %1918 = vmatprep.subr.bf16.mxu1 %v2101_v20 }
 0x6e6   : > { %1909 = vmatmul.mubr.msk.bf16.vlgmr.msra.gmra.mrb[8].mxu1 %vm906_vm5, %v1154_v17  ;;  %v2009_v17 = vld [vmem:[%s2261_s22 + $0x10] sm:$0xff]  }
 0x6e7   : > { %1922 = vmatprep.mubr.msk.bf16.mxu1 %vm2102_vm2, %v2101_v20  ;;  %1919 = vmatpush3.bf16.msra.mxu1 %v2003_v21  ;;  %v2013_v21 = vld [vmem:[%s2261_s22 + $0x30] sm:$0xff]  }
 0x6e8   : > { %v2034_v44 = vpop.eup %2033  ;;  %1920 = vmatprep.subr.bf16.mxu1 %v2101_v20 }
 0x6e9   : > { %v1153_v18 = vmul.f32 %v2034_v44, %v2030_v10  ;;  %v2010_v44 = vld [vmem:[%s2261_s22 + $0x18] sm:$0xff]  }
 0x6eb   : > { %v1155_v19 = vpack.c.bf16 %v1153_v18, %v1153_v18  ;;  %1921 = vmatpush3.bf16.msra.mxu1 %v2004_v22  ;;  %v2011_v18 = vld [vmem:[%s2261_s22 + $0x20] sm:$0xff]   ;;  %v2014_v22 = vld [vmem:[%s2261_s22 + $0x38] sm:$0xff]  }
 0x6ec   : > { %1934 = vmatprep.subr.bf16.mxu1 %v2101_v20 }
 0x6ed   : > { %1915 = vmatmul.mubr.msk.bf16.vlgmr.msra.gmra.mrb[20].mxu0 %vm906_vm5, %v1155_v19  ;;  %v2012_v19 = vld [vmem:[%s2261_s22 + $0x28] sm:$0xff]  }
 0x6ee   : > { %1930 = vmatprep.mubr.msk.bf16.mxu0 %vm2102_vm2, %v2101_v20  ;;  %1927 = vmatpush3.bf16.msra.mxu0 %v2005_v60 }
 0x6ef   : > { %1928 = vmatprep.subr.bf16.mxu0 %v2101_v20 }
 0x6f2   : > { %1929 = vmatpush3.bf16.msra.mxu0 %v2006_v61 }
 0x7b9   : > { %v1198_v23 = vpop.f32.mrb[8].mxu1 }
 0x7ba   : > { %v1910_v24 = vpop.f32.mrb[9].mxu1 }
 0x7bb   : > { %v1201_v25 = vpop.f32.mrb[10].mxu1 }
 0x7bc   : > { %v1911_v26 = vpop.f32.mrb[11].mxu1 }
 0x7c0   : > { %v1246_v27 = vpop.f32.mrb[20].mxu0 }
 0x7c1   : > { %v1996_v28 = vpack.i.bf16 %v1246_v27, %v1198_v23  ;;  %v1916_v29 = vpop.f32.mrb[21].mxu0  ;;  %v1804_v23 = vld [vmem:[%s656_s6] ss:$0 sm:$0xff] }
 0x7c2   : > { %v1249_v30 = vpop.f32.mrb[22].mxu0 }
 0x7c3   : > { %1997 = vrot.lane.b32.xlu1 %v1996_v28, %s2109_s24  ;;  %v1917_v31 = vpop.f32.mrb[23].mxu0 }
 0x835   : > { %v1998_v32 = vpop.permute.xlu1 %1997 }
 0x836   : > { %v2000_v33 = vunpack.i.h.bf16 %v1998_v32  ;;  %v1999_v34 = vunpack.i.l.bf16 %v1998_v32 }
 0x838   : > { %v1261_v35 = vsel %vm806_vm3, %v2371_v42, %v2000_v33  ;;  %v1260_v36 = vsel %vm806_vm3, %v2369_v38, %v1999_v34 }
 0x839   : > { %v1262_v37 = vpack.c.bf16 %v1261_v35, %v1260_v36 }
 0x83b   : > { %1923 = vmatmul.mubr.msk.bf16.vlgmr.msra.gmra.mrb[12].mxu1 %vm683_vm1, %v1262_v37 }
 0x83c   : > { %1950 = vmatprep.mubr.msk.bf16.mxu1 %vm2102_vm2, %v2101_v20  ;;  %1935 = vmatpush3.bf16.msra.mxu1 %v2007_v15 }
 0x83d   : > { %1936 = vmatprep.subr.bf16.mxu1 %v2101_v20 }
 0x840   : > { %1937 = vmatpush3.bf16.msra.mxu1 %v2008_v16 }
 0x841   : > { %1938 = vmatprep.subr.bf16.mxu1 %v2101_v20 }
 0x844   : > { %1939 = vmatpush3.bf16.msra.mxu1 %v2009_v17 }
 0x845   : > { %1940 = vmatprep.subr.bf16.mxu1 %v2101_v20 }
 0x848   : > { %1941 = vmatpush3.bf16.msra.mxu1 %v2010_v44 }
 0x849   : > { %1942 = vmatprep.subr.bf16.mxu1 %v2101_v20 }
 0x84c   : > { %1943 = vmatpush3.bf16.msra.mxu1 %v2011_v18 }
 0x84d   : > { %1944 = vmatprep.subr.bf16.mxu1 %v2101_v20 }
 0x850   : > { %1945 = vmatpush3.bf16.msra.mxu1 %v2012_v19 }
 0x851   : > { %1946 = vmatprep.subr.bf16.mxu1 %v2101_v20 }
 0x854   : > { %1947 = vmatpush3.bf16.msra.mxu1 %v2013_v21 }
 0x855   : > { %1948 = vmatprep.subr.bf16.mxu1 %v2101_v20 }
 0x858   : > { %1949 = vmatpush3.bf16.msra.mxu1 %v2014_v22 }
 0x90e   : > { %v1323_v40 = vpop.f32.mrb[12].mxu1 }
 0x90f   : > { %v1324_v41 = vadd.f32 %v1798_v39, %v1323_v40  ;;  %v1924_v43 = vpop.f32.mrb[13].mxu1 }
 0x910   : > { %v1326_v45 = vpop.f32.mrb[14].mxu1 }
 0x911   : > { %v2408_v42 = vadd.f32 %v1324_v41, %v2277_v5  ;;  %v1327_v46 = vadd.f32 %v1798_v39, %v1326_v45  ;;  %v1925_v38 = vpop.f32.mrb[15].mxu1  ;;  %v1810_v45 = vld [vmem:[%s664_s26] ss:$0 sm:$0xff] }
 0x913   : > { %v2411_v48 = vadd.f32 %v1327_v46, %v2279_v6  ;;  %v1334_v49 = vsel %vm683_vm1, %v2408_v42, 0.0 }
 0x914   : > { %1335 = vadd.xlane.f32.xlu1 %v1334_v49 }
 0x915   : > { %v1337_v50 = vsel %vm683_vm1, %v2411_v48, 0.0 }
 0x916   : > { %1338 = vadd.xlane.f32.xlu0 %v1337_v50 }
 0x9a1   : > { %v1336_v51 = vpop.xlane.xlu1 %1335 }
 0x9a2   : > { %v1340_v52 = vmul.f32 0.03125, %v1336_v51 }
 0x9a3   : > { %v1339_v53 = vpop.xlane.xlu0 %1338 }
 0x9a4   : > { %v1342_v5 = vsub.f32 %v2408_v42, %v1340_v52  ;;  %v1341_v54 = vmul.f32 0.03125, %v1339_v53 }
 0x9a6   : > { %v1343_v55 = vsub.f32 %v2411_v48, %v1341_v54  ;;  %v1344_v6 = vmul.f32 %v1342_v5, %v1342_v5 }
 0x9a8   : > { %v1346_v56 = vsel %vm683_vm1, %v1344_v6, 0.0  ;;  %v1345_v58 = vmul.f32 %v1343_v55, %v1343_v55 }
 0x9a9   : > { %1347 = vadd.xlane.f32.xlu0 %v1346_v56 }
 0x9aa   : > { %v1349_v59 = vsel %vm683_vm1, %v1345_v58, 0.0 }
 0x9ad   : > { %1350 = vadd.xlane.f32.xlu0 %v1349_v59 }
 0xa36   : > { %v1348_v62 = vpop.xlane.xlu0 %1347 }
 0xa37   : > { %v1352_v63 = vmul.f32 0.03125, %v1348_v62 }
 0xa39   : > { %v1354_v0 = vadd.f32 1e-05, %v1352_v63 }
 0xa3a   : > { %v1351_v1 = vpop.xlane.xlu0 %1350 }
 0xa3b   : > { %2035 = vrsqrt.f32 %v1354_v0  ;;  %v1353_v2 = vmul.f32 0.03125, %v1351_v1 }
 0xa3d   : > { %v1355_v3 = vadd.f32 1e-05, %v1353_v2 }
 0xa3f   : > { %2037 = vrsqrt.f32 %v1355_v3 }
 0xa45   : > { %v2036_v4 = vpop.eup %2035 }
 0xa46   : > { %v1358_v7 = vmul.f32 %v2036_v4, %v1342_v5 }
 0xa48   : > { %v1366_v57 = vmul.f32 %v1802_v8, %v1358_v7 }
 0xa49   : > { %v2038_v9 = vpop.eup %2037 }
 0xa4a   : > { %v1359_v10 = vmul.f32 %v2038_v9, %v1343_v55  ;;  %v1374_v12 = vadd.f32 %v1803_v47, %v1366_v57 }
 0xa4c   : > { %v1367_v11 = vmul.f32 %v1802_v8, %v1359_v10 }
 0xa4e   : > { %v1375_v13 = vadd.f32 %v1803_v47, %v1367_v11 }
 0xa50   : > { %v1376_v14 = vpack.c.bf16 %v1375_v13, %v1374_v12 }
 0xa52   : > { %1931 = vmatmul.mubr.msk.bf16.vlgmr.msra.gmra.mrb[24].mxu0 %vm683_vm1, %v1376_v14 }
 0xb25   : > { %v1437_v24 = vpop.f32.mrb[24].mxu0 }
 0xb26   : > { %v1438_v25 = vadd.f32 %v1804_v23, %v1437_v24  ;;  %v1932_v26 = vpop.f32.mrb[25].mxu0 }
 0xb27   : > { %v1440_v27 = vpop.f32.mrb[26].mxu0 }
 0xb28   : > { %v1808_v28 = vmul.f32 -1.702, %v1438_v25  ;;  %v1441_v29 = vadd.f32 %v1804_v23, %v1440_v27  ;;  %v1933_v30 = vpop.f32.mrb[27].mxu0 }
 0xb2a   : > { %v1448_v31 = vmul.f32 1.442695, %v1808_v28  ;;  %v1809_v32 = vmul.f32 -1.702, %v1441_v29 }
 0xb2c   : > { %2039 = vpow2.f32 %v1448_v31  ;;  %v1450_v33 = vmul.f32 1.442695, %v1809_v32 }
 0xb2e   : > { %2041 = vpow2.f32 %v1450_v33 }
 0xb36   : > { %v2040_v20 = vpop.eup %2039 }
 0xb37   : > { %v1452_v34 = vadd.f32 1.0, %v2040_v20 }
 0xb38   : > { %v2042_v35 = vpop.eup %2041 }
 0xb39   : > { %2043 = vrcp.f32 %v1452_v34  ;;  %v1453_v36 = vadd.f32 1.0, %v2042_v35 }
 0xb3b   : > { %2045 = vrcp.f32 %v1453_v36 }
 0xb43   : > { %v2044_v37 = vpop.eup %2043 }
 0xb44   : > { %v1458_v40 = vmul.f32 %v2044_v37, %v1438_v25 }
 0xb45   : > { %v2046_v39 = vpop.eup %2045 }
 0xb46   : > { %v1459_v41 = vmul.f32 %v2046_v39, %v1441_v29 }
 0xb48   : > { %v1460_v43 = vpack.c.bf16 %v1459_v41, %v1458_v40 }
 0xb4a   : > { %1951 = vmatmul.mubr.bf16.vlgmr.msra.gmra.mrb[16].mxu1 %v1460_v43 }
 0xc1d   : > { %v1566_v46 = vpop.f32.mrb[16].mxu1 }
 0xc1e   : > { %v1567_v38 = vadd.f32 %v1810_v45, %v1566_v46  ;;  %v1952_v49 = vpop.f32.mrb[17].mxu1  ;;  %1580 = sbr.rel (%p1819_p6) target bundleno = 3117 (0xc2d), region = 84 }
 0xc1f   : > { %v1569_v50 = vpop.f32.mrb[18].mxu1 }
 0xc20   : > { %v1573_v51 = vadd.f32 %v1567_v38, %v2408_v42  ;;  %v1570_v52 = vadd.f32 %v1810_v45, %v1569_v50  ;;  %v1953_v53 = vpop.f32.mrb[19].mxu1 }
 0xc22   : > { %1575 = vst.msk [vmem:[#allocation2] sm:$0xff] %vm683_vm1, %v1573_v51  ;;  %v1574_v5 = vadd.f32 %v1570_v52, %v2411_v48 }
 0xc24   : > { %1576 = vst.msk [vmem:[#allocation2 + $0x8] sm:$0xff] %vm683_vm1, %v1574_v5 }
 0xc29   : > { %v1581_v54 = vld [vmem:[#allocation2] sm:$0xff] }
 0xc2a   : > { %1583 = vst.msk [vmem:[#allocation3] sm:$0xff] %vm683_vm1, %v1581_v54 }
 0xc2b   : > { %v1582_v55 = vld [vmem:[#allocation2 + $0x8] sm:$0xff] }
 0xc2c   : > { %1584 = vst.msk [vmem:[#allocation3 + $0x8] sm:$0xff] %vm683_vm1, %v1582_v55 }
 0xc2d PF: > { %s2540_s18 = sld [smem:[#allocation7_spill]]  ;;  %s2110_s14 = smov [#allocation3]  }
 0xc2e   : > { %s1594_s16 = sshll.u32 %s2110_s14, 4  ;;  %s1595_s16 = int_to_ptr.vmem [resolvable:$true] %s1594_s16 }
 0xc2f   : > { %s2047_s15 = scalar_lea.vmem %s1595_s16, 256  ;;  %p2054_p11 = scmp.lt.s32.totalorder %s1595_s16, %s1595_s16 }
 0xc30   : > { %p2048_p8 = scmp.ne.s32.totalorder %s1595_s16, %s2047_s15  ;;  %p2055_p12 = scmp.lt.s32.totalorder %s2047_s15, %s2047_s15 }
 0xc32   : > { %p2056_p13 = por %p2055_p12, %p2054_p11 }
 0xc33   : > { %s2541_s26 = sadd.s32 4294967295, %s2540_s18  }
 0xc34   : > { %p2469_p7 = scmp.eq.s32.totalorder %s2541_s26, 1 }
 0xc36   : > { %p2049_p9 = pnand %p2048_p8, %p2469_p7 }
 0xc38   : > { %p2050_p10 = pneg %p2049_p9 }
 0xc3a   : > { %p2057_p0 = pnand %p2056_p13, %p2050_p10 }
 0xc3c   : > { %2060 = shalt.err (!%p2057_p0)
}
 0xc3d   : > { %s2543_s24 = sld [smem:[#allocation13_spill]] }
 0xc43   : > { %s2061_s23 = scalar_lea.hbm %s2543_s24, 256 }
 0xc44   : > { %p2062_p1 = scmp.ne.s32.totalorder %s2543_s24, %s2061_s23  ;;  %p2067_p4 = scmp.lt.u32.totalorder %s2061_s23, %s2543_s24 }
 0xc46   : > { %p2063_p2 = pnand %p2062_p1, %p2469_p7 }
 0xc48   : > { %p2064_p3 = pneg %p2063_p2 }
 0xc4a   : > { %p2069_p5 = pnand %p2067_p4, %p2064_p3 }
 0xc4c   : > { %2072 = shalt.err (!%p2069_p5)
}
 0xc4d   : > { %s2111_s4 = smov 128   ;;  %s2112_s30 = smov 8  }
 0xc4e   : > { %1955 = dma.vmem_to_hbm [thread:$0]  (%p2469_p7), %s1595_s16, 256, %s2543_s24, [#allocation4], %s2111_s4, %s2111_s4, %s2112_s30  }
 0xc4f   : > { %2086 = dma.done.wait (%p2469_p7), [#allocation4], 256  }
 0xc50   : > { %2088 = vsyncadd (%p2469_p7), [#allocation4], 4294967040 }
 0xc51 PF: > { %s2544_s6 = sld [smem:[#allocation7_spill]]  ;;  %s2545_s29 = sld [smem:[#allocation6_spill]] }
 0xc52   : > { %s2546_s30 = sld [smem:[#allocation8_spill]] }
 0xc57   : > { %s25_s15 = sadd.s32 1, %s2544_s6  }
 0xc58   : > { %p22_p6 = scmp.ge.s32.totalorder %s25_s15, 4  }
 0xc5a   :  { %24 = sbr.rel (!%p22_p6) target bundleno = 7 (0x7), region = 148 }
 0xc61   :  { %1610 = vsyncpa [#allocation4], 1 }
 0xc62   :  { %1612 = vsyncpa [#allocation4 + $0x1], 1 }

</bundles_post_ra>
